<compile_context>
chip_gen: v7x
topology: tpu7x:2x2x1
jax: 0.10.0
libtpu: 0.0.40
codegen_flags: <defaults>
</compile_context>

<pallas_src>
import functools

import jax
import jax.numpy as jnp
from jax.experimental import pallas as pl
from jax.experimental.pallas import tpu as pltpu

# ----------------------- static hyper-parameters -----------------------
N_IN = 8        # n_inputs
N_OUT = 16      # n_outputs
KSIZE = 3       # kernel_size
STRIDE = 1      # stride
DILATION = 1    # dilation
PADDING = (KSIZE - 1) * DILATION   # = 2, even -> symmetric chomp OK
T = 16          # sequence length
BATCH = 2
EPS = 1e-5      # BatchNorm1d default eps


def _tcl_kernel(x_ref, w_ref, p_ref, o_ref, *, ksize, dilation, w_out):
    """Fused Conv1d + folded bias/BN + PReLU over a lane-dense slab.

    x_ref: (C_in, w_out + 2*ch)   activation slab: batch fused into lanes,
                                  per-batch zero halo already inserted, plus
                                  `ch` edge columns so tap slices stay in bounds
    w_ref: (C_out, K*C_in)        BN-scale-folded conv weight, tap-major
    p_ref: (C_out, 2)             col 0 = shift (bias+BN folded), col 1 = alpha
    o_ref: (C_out, w_out)         pre-chomp output slab
    """
    x = x_ref[...]
    # im2col: stack the K statically-shifted views along the channel (sublane)
    # axis so the whole conv is a single MXU matmul instead of K tiny ones.
    xcol = jnp.concatenate(
        [x[:, k * dilation:k * dilation + w_out] for k in range(ksize)],
        axis=0)                                            # (K*C_in, w_out)
    y = jnp.dot(w_ref[...], xcol, preferred_element_type=jnp.float32)
    y = y + p_ref[:, 0:1]                                  # folded bias + BN
    alpha = p_ref[:, 1:2]
    o_ref[...] = jnp.where(y > 0, y, alpha * y).astype(o_ref.dtype)


def temporal_conv_layer(x, w, b, gamma, beta, run_mean, run_var, alpha):
    """x: (N, C_in, T) float32 -> (N, C_out, T) float32."""
    n, c_in, t = x.shape
    c_out, _, ksize = w.shape
    assert STRIDE == 1
    padding = (ksize - 1) * DILATION
    assert padding % 2 == 0, "symmetric chomp requires even padding"
    ch = padding // 2                      # columns chomped from each side

    f32 = jnp.float32
    # ---- fold conv bias + BatchNorm1d (inference) into weight & shift ----
    #   BN(conv(x) + b) = scale * conv(x) + shift
    scale = gamma.astype(f32) * jax.lax.rsqrt(run_var.astype(f32) + EPS)
    shift = (b.astype(f32) - run_mean.astype(f32)) * scale + beta.astype(f32)
    # (C_out, C_in, K) -> scaled, tap-major, flattened 2-D (C_out, K*C_in).
    w_flat = (w.astype(f32) * scale[:, None, None]) \
        .transpose(0, 2, 1).reshape(c_out, ksize * c_in)
    # Single packed per-channel param tile.
    params = jnp.stack([shift, alpha.astype(f32)], axis=1)     # (C_out, 2)

    # ---- lane-dense activation slab (layout plumbing, fuses the conv pad) ----
    p_len = t + 2 * ch                                    # per-batch padded len
    slab = jnp.pad(x.astype(f32), ((0, 0), (0, 0), (ch, ch)))   # (N, C_in, P)
    slab = slab.transpose(1, 0, 2).reshape(c_in, n * p_len)     # (C_in, N*P)
    slab = jnp.pad(slab, ((0, 0), (ch, ch)))              # (C_in, N*P + 2*ch)

    w_out = n * p_len
    kern = functools.partial(
        _tcl_kernel, ksize=ksize, dilation=DILATION, w_out=w_out)

    out_slab = pl.pallas_call(
        kern,
        out_shape=jax.ShapeDtypeStruct((c_out, w_out), f32),
        grid=(1,),                      # whole batch fused: single invocation
        in_specs=[
            pl.BlockSpec((c_in, w_out + 2 * ch), lambda i: (0, 0)),   # slab
            pl.BlockSpec((c_out, ksize * c_in), lambda i: (0, 0)),    # weight
            pl.BlockSpec((c_out, 2), lambda i: (0, 0)),               # params
        ],
        out_specs=pl.BlockSpec((c_out, w_out), lambda i: (0, 0)),
        compiler_params=pltpu.CompilerParams(
            dimension_semantics=("arbitrary",)),
    )(slab, w_flat, params)

    # Symmetric chomp (drop the per-batch halo columns) + restore NCT layout.
    out = out_slab.reshape(c_out, n, p_len)[:, :, ch:ch + t].transpose(1, 0, 2)
    return out.astype(x.dtype)


def _reference(x, w, b, gamma, beta, run_mean, run_var, alpha):
    """Pure-JAX reference of the same forward pass (unfused)."""
    y = jax.lax.conv_general_dilated(
        x, w, window_strides=(STRIDE,), padding=[(PADDING, PADDING)],
        rhs_dilation=(DILATION,),
        dimension_numbers=("NCH", "OIH", "NCH"))
    y = y + b[None, :, None]
    inv_std = jax.lax.rsqrt(run_var + EPS)
    y = (y - run_mean[None, :, None]) * inv_std[None, :, None] \
        * gamma[None, :, None] + beta[None, :, None]
    # symmetric chomp
    y = y[:, :, PADDING // 2: y.shape[2] - PADDING // 2]
    # PReLU
    a = alpha[None, :, None]
    return jnp.where(y > 0, y, a * y)


if __name__ == "__main__":
    key = jax.random.PRNGKey(0)
    kx, kw, kb, kg, kbe, km, kv = jax.random.split(key, 7)

    x = jax.random.normal(kx, (BATCH, N_IN, T), dtype=jnp.float32)

    # Deterministic synthetic parameters (shapes match nn.Conv1d / BN / PReLU).
    w = 0.1 * jax.random.normal(kw, (N_OUT, N_IN, KSIZE), dtype=jnp.float32)
    b = 0.05 * jax.random.normal(kb, (N_OUT,), dtype=jnp.float32)
    gamma = 1.0 + 0.1 * jax.random.normal(kg, (N_OUT,), dtype=jnp.float32)
    beta = 0.1 * jax.random.normal(kbe, (N_OUT,), dtype=jnp.float32)
    run_mean = 0.1 * jax.random.normal(km, (N_OUT,), dtype=jnp.float32)
    run_var = jnp.abs(1.0 + 0.1 * jax.random.normal(kv, (N_OUT,),
                                                    dtype=jnp.float32))
    alpha = jnp.full((N_OUT,), 0.25, dtype=jnp.float32)  # nn.PReLU init

    out = temporal_conv_layer(x, w, b, gamma, beta, run_mean, run_var, alpha)
    out = jax.block_until_ready(out)

    ref = _reference(x, w, b, gamma, beta, run_mean, run_var, alpha)
    assert out.shape == (BATCH, N_OUT, T), out.shape
    assert jnp.allclose(out, ref, atol=1e-4, rtol=1e-4), \
        float(jnp.max(jnp.abs(out - ref)))

    print("KERNEL_OK")
</pallas_src>

<mosaic_0001>
module attributes {stable_mosaic.version = 11 : i64} {
  func.func @_tcl_kernel(%arg0: i32, %arg1: memref<8x38xf32, #tpu.memory_space<vmem>>, %arg2: memref<16x24xf32, #tpu.memory_space<vmem>>, %arg3: memref<16x2xf32, #tpu.memory_space<vmem>>, %arg4: memref<16x36xf32, #tpu.memory_space<vmem>>) attributes {dimension_semantics = [#tpu.dimension_semantics<arbitrary>], iteration_bounds = array<i64: 1>, scalar_prefetch = 0 : i64, scratch_operands = 0 : i64, tpu.core_type = #tpu.core_type<tc>, window_params = [{pipeline_mode = #tpu.pipeline_mode<synchronous>, transform_indices = @transform_0, window_bounds = array<i64: 8, 38>}, {pipeline_mode = #tpu.pipeline_mode<synchronous>, transform_indices = @transform_1, window_bounds = array<i64: 16, 24>}, {pipeline_mode = #tpu.pipeline_mode<synchronous>, transform_indices = @transform_2, window_bounds = array<i64: 16, 2>}, {pipeline_mode = #tpu.pipeline_mode<synchronous>, transform_indices = @transform_3, window_bounds = array<i64: 16, 36>}]} {
    %c0 = arith.constant 0 : index
    %c0_0 = arith.constant 0 : index
    %0 = vector.load %arg1[%c0, %c0_0] : memref<8x38xf32, #tpu.memory_space<vmem>>, vector<8x38xf32>
    %1 = vector.extract_strided_slice %0 {offsets = [0, 0], sizes = [8, 36], strides = [1, 1]} : vector<8x38xf32> to vector<8x36xf32>
    %2 = vector.extract_strided_slice %0 {offsets = [0, 1], sizes = [8, 36], strides = [1, 1]} : vector<8x38xf32> to vector<8x36xf32>
    %3 = vector.extract_strided_slice %0 {offsets = [0, 2], sizes = [8, 36], strides = [1, 1]} : vector<8x38xf32> to vector<8x36xf32>
    %4 = tpu.concatenate %1, %2, %3 in 0 : vector<8x36xf32>, vector<8x36xf32>, vector<8x36xf32> -> vector<24x36xf32>
    %c0_1 = arith.constant 0 : index
    %c0_2 = arith.constant 0 : index
    %5 = vector.load %arg2[%c0_1, %c0_2] : memref<16x24xf32, #tpu.memory_space<vmem>>, vector<16x24xf32>
    %cst = arith.constant dense<0.000000e+00> : vector<16x36xf32>
    %6 = tpu.matmul %5, %4, %cst {dimension_numbers = #tpu.dot_dimension_numbers<[1], [0], [0], [1], [0, 0, 1, 1], [], []>} : vector<16x24xf32>, vector<24x36xf32>, vector<16x36xf32> -> vector<16x36xf32>
    %c0_3 = arith.constant 0 : index
    %c0_4 = arith.constant 0 : index
    %7 = vector.load %arg3[%c0_3, %c0_4] : memref<16x2xf32, #tpu.memory_space<vmem>>, vector<16x1xf32>
    %8 = vector.broadcast %7 : vector<16x1xf32> to vector<16x36xf32>
    %9 = arith.addf %6, %8 : vector<16x36xf32>
    %c0_5 = arith.constant 0 : index
    %c1 = arith.constant 1 : index
    %10 = vector.load %arg3[%c0_5, %c1] : memref<16x2xf32, #tpu.memory_space<vmem>>, vector<16x1xf32>
    %cst_6 = arith.constant 0.000000e+00 : f32
    %11 = vector.broadcast %cst_6 : f32 to vector<16x36xf32>
    %12 = arith.cmpf ogt, %9, %11 : vector<16x36xf32>
    %13 = vector.broadcast %10 : vector<16x1xf32> to vector<16x36xf32>
    %14 = arith.mulf %13, %9 : vector<16x36xf32>
    %15 = arith.select %12, %9, %14 : vector<16x36xi1>, vector<16x36xf32>
    %c0_7 = arith.constant 0 : index
    %c0_8 = arith.constant 0 : index
    %16 = vector.load %arg4[%c0_7, %c0_8] : memref<16x36xf32, #tpu.memory_space<vmem>>, vector<16x36xf32>
    tpu.vector_store %arg4[%c0_7, %c0_8], %15 {strides = array<i32>} : memref<16x36xf32, #tpu.memory_space<vmem>>, vector<16x36xf32>,
    return
  }
  func.func @transform_0(%arg0: i32) -> (i32, i32) {
    %c0_i32 = arith.constant 0 : i32
    %c0_i32_0 = arith.constant 0 : i32
    %c0_i32_1 = arith.constant 0 : i32
    return %c0_i32, %c0_i32_0 : i32, i32
  }
  func.func @transform_1(%arg0: i32) -> (i32, i32) {
    %c0_i32 = arith.constant 0 : i32
    %c0_i32_0 = arith.constant 0 : i32
    %c0_i32_1 = arith.constant 0 : i32
    return %c0_i32, %c0_i32_0 : i32, i32
  }
  func.func @transform_2(%arg0: i32) -> (i32, i32) {
    %c0_i32 = arith.constant 0 : i32
    %c0_i32_0 = arith.constant 0 : i32
    %c0_i32_1 = arith.constant 0 : i32
    return %c0_i32, %c0_i32_0 : i32, i32
  }
  func.func @transform_3(%arg0: i32) -> (i32, i32) {
    %c0_i32 = arith.constant 0 : i32
    %c0_i32_0 = arith.constant 0 : i32
    %c0_i32_1 = arith.constant 0 : i32
    return %c0_i32, %c0_i32_0 : i32, i32
  }
}

</mosaic_0001>

<bundles_post_ra>
// kernel: tpu_custom_call.1
= control target key start
LH: loop header
LB: loop body
LE: loop exit
PB: predicated region body
PF: predicated region fallthrough
CT: control target
= control target key end

     0   :  { %8 = vsyncpa [#allocation3], 0  ;;  %s310_s0 = inlined_call_operand.hbm [shape: f32[8,38], index: 0, kind: input, shape index: {}]   ;;  %s311_s1 = inlined_call_operand.vmem [shape: f32[16,24], index: 1, kind: input, shape index: {}]   ;;  %s312_s2 = inlined_call_operand.vmem [shape: f32[16,2], index: 2, kind: input, shape index: {}]   ;;  %s313_s3 = inlined_call_operand.hbm [shape: f32[16,36], index: 3, kind: output, shape index: {}]  }
   0x1   :  { %9 = vsyncpa [#allocation4], 0  ;;  %s244_s12 = smov [#allocation2]   ;;  %s196_s16 = scalar_lea.hbm %s310_s0, 128 }
   0x2   :  { %s16_s13 = sshll.u32 %s244_s12, 4  ;;  %p197_p0 = scmp.ne.s32.totalorder %s310_s0, %s196_s16  ;;  %s17_s13 = int_to_ptr.vmem [resolvable:$true] %s16_s13 }
   0x3   :  { %p200_p1 = scmp.lt.u32.totalorder %s196_s16, %s310_s0 }
   0x5   :  { %p202_p2 = pnand %p200_p1, %p197_p0 }
   0x7   :  { %205 = shalt.err (!%p202_p2)
}
   0x8   :  { %s206_s21 = scalar_lea.vmem %s17_s13, 128  ;;  %p211_p4 = scmp.lt.s32.totalorder %s17_s13, %s17_s13 }
   0x9   :  { %p207_p3 = scmp.ne.s32.totalorder %s17_s13, %s206_s21  ;;  %p212_p5 = scmp.lt.s32.totalorder %s206_s21, %s206_s21 }
   0xb   :  { %p213_p6 = por %p212_p5, %p211_p4 }
   0xd   :  { %p214_p7 = pnand %p213_p6, %p207_p3 }
   0xf   :  { %217 = shalt.err (!%p214_p7)
}
  0x10   :  { %19 = dma.hbm_to_vmem [thread:$0]  %s310_s0, 128, %s17_s13, [#allocation3]  }
  0x11   :  { %240 = dma.done.wait [#allocation3], 128  }
  0x12   :  { %241 = vsyncadd [#allocation3], 4294967168  ;;  %v245_v0 = vmov 0   ;;  %v246_v1 = vmov 1   ;;  %vm49_vm0 = vcmask 195584   ;;  %v27_v2 = vld [vmem:[#allocation2] sm:$0xff] }
  0x13   :  { %193 = vset.pattern.permute.xlu1 %v245_v0  ;;  %194 = vset.pattern.permute.xlu0 %v246_v1  ;;  %v35_v3 = vld [vmem:[%s311_s1] sm:$0xff]  ;;  %s247_s26 = smov 127   ;;  %v38_v5 = vld [vmem:[%s312_s2 + $0x8] sm:$0xff]  ;;  %s248_s30 = smov 126   ;;  %vm145_vm2 = vcmask 293888  }
  0x14   :  { %29 = vrot.lane.b32.xlu0 %v27_v2, %s247_s26  ;;  %178 = vmatprep.mubr.msk.f32.mxu0 %vm49_vm0, %v35_v3  ;;  %v37_v4 = vld [vmem:[%s312_s2] sm:$0xff]  ;;  %v36_v9 = vld [vmem:[%s311_s1 + $0x8] sm:$0xff]  ;;  %s249_s2 = smov [#allocation5]  }
  0x15   :  { %41 = vperm.xlu1 %193, %v37_v4   ;;  %s153_s6 = sshll.u32 %s249_s2, 4  ;;  %s154_s6 = int_to_ptr.vmem [resolvable:$true] %s153_s6 }
  0x16   :  { %s218_s1 = scalar_lea.vmem %s154_s6, 256  ;;  %p223_p9 = scmp.lt.s32.totalorder %s154_s6, %s154_s6 }
  0x17   :  { %p219_p8 = scmp.ne.s32.totalorder %s154_s6, %s218_s1  ;;  %p224_p10 = scmp.lt.s32.totalorder %s218_s1, %s218_s1 }
  0x18   :  { %32 = vrot.lane.b32.xlu0 %v27_v2, %s248_s30 }
  0x19   :  { %46 = vperm.xlu1 %193, %v38_v5   ;;  %p225_p11 = por %p224_p10, %p223_p9 }
  0x1b   :  { %p226_p12 = pnand %p225_p11, %p219_p8 }
  0x1c   :  { %134 = vperm.xlu0 %194, %v37_v4  }
  0x1d   :  { %195 = vset.pattern.permute.xlu1 %v246_v1 }
  0x1e   :  { %138 = vperm.xlu1 %195, %v38_v5  }
  0x86   :  { %v30_v6 = vpop.permute.xlu0 %29 }
  0x87   :  { %v181_v7 = vpack.c.bf16 %v30_v6, %v27_v2 }
  0x89   :  { %182 = vmatprep.subr.bf16.mxu0 %v181_v7 }
  0x8a   :  { %184 = vmatpush3.bf16.msra.mxu0 %v181_v7  ;;  %v33_v8 = vpop.permute.xlu0 %32 }
  0x8b   :  { %176 = vmatprep.subr.mxu0 %v33_v8 }
  0x8e   :  { %177 = vmatpush3.msra.mxu0 %v33_v8 }
  0x8f   :  { %179 = vmatmul.mubr.msk.f32.vlgmr.msra.gmra.mrb[0].mxu0 %vm49_vm0, %v36_v9 }
  0x94   :  { %v42_v10 = vpop.permute.xlu1 %41 }
  0x98   :  { %v47_v11 = vpop.permute.xlu1 %46 }
  0x9b   :  { %v135_v16 = vpop.permute.xlu0 %134 }
  0x9d   :  { %v139_v13 = vpop.permute.xlu1 %138 }
 0x162   :  { %v180_v12 = vpop.f32.mrb[0].mxu0 }
 0x163   :  { %v128_v14 = vadd.f32 %v180_v12, %v47_v11  ;;  %v122_v15 = vpop.f32.mrb[1].mxu0 }
 0x164   :  { %v123_v17 = vadd.f32 %v122_v15, %v42_v10 }
 0x165   :  { %vm132_vm1 = vcmp.gt.f32.partialorder %v128_v14, 0.0  ;;  %v142_v18 = vmul.f32 %v139_v13, %v128_v14 }
 0x166   :  { %vm131_vm3 = vcmp.gt.f32.partialorder %v123_v17, 0.0  ;;  %v141_v19 = vmul.f32 %v135_v16, %v123_v17 }
 0x167   :  { %v144_v20 = vsel %vm132_vm1, %v128_v14, %v142_v18 }
 0x168   :  { %147 = vst.msk [vmem:[#allocation5 + $0x8] sm:$0xff] %vm145_vm2, %v144_v20  ;;  %v143_v21 = vsel %vm131_vm3, %v123_v17, %v141_v19 }
 0x169   :  { %146 = vst.msk [vmem:[#allocation5] sm:$0xff] %vm145_vm2, %v143_v21 }
 0x16a   :  { %229 = shalt.err (!%p226_p12)
}
 0x16b   :  { %s230_s9 = scalar_lea.hbm %s313_s3, 256 }
 0x16c   :  { %p231_p13 = scmp.ne.s32.totalorder %s313_s3, %s230_s9  ;;  %p234_p0 = scmp.lt.u32.totalorder %s230_s9, %s313_s3 }
 0x16e   :  { %p236_p1 = pnand %p234_p0, %p231_p13 }
 0x170   :  { %239 = shalt.err (!%p236_p1)
}
 0x171   :  { %s250_s14 = smov 128   ;;  %s251_s15 = smov 8  }
 0x172   :  { %159 = dma.vmem_to_hbm [thread:$0]  %s154_s6, 256, %s313_s3, [#allocation4], %s250_s14, %s250_s14, %s251_s15  }
 0x173   :  { %242 = dma.done.wait [#allocation4], 256  }
 0x174   :  { %243 = vsyncadd [#allocation4], 4294967040 }
 0x175   :  { %163 = vsyncpa [#allocation3], 1 }
 0x176   :  { %164 = vsyncpa [#allocation4], 1 }

</bundles_post_ra>
